<compile_context>
chip_gen: v7x
topology: tpu7x:2x2x1
jax: 0.10.0
libtpu: 0.0.40
codegen_flags: <defaults>
</compile_context>

<pallas_src>
import functools
import math

import jax
import jax.numpy as jnp
from jax.experimental import pallas as pl
from jax.experimental.pallas import tpu as pltpu

LN_EPS = 1e-5          # torch.nn.LayerNorm default
BN_EPS = 1e-5          # torch.nn.BatchNorm1d default


# ---------------------------------------------------------------------------
# Hardware-aware sizing helpers.
# ---------------------------------------------------------------------------
@functools.lru_cache(maxsize=None)
def _device_kind():
    try:
        return jax.devices()[0].device_kind.lower()
    except Exception:
        return ""


@functools.lru_cache(maxsize=None)
def _vmem_capacity_bytes():
    try:
        return int(pltpu.get_tpu_info().vmem_capacity_bytes)
    except Exception:
        return 64 * 1024 * 1024          # conservative fallback (v7x per-TC size)


@functools.lru_cache(maxsize=None)
def _vmem_limit_bytes():
    # ~75% of physical VMEM: ~96 MiB on 128 MiB parts (v5e/v6e), ~48 MiB on v7x.
    return max(16 * 1024 * 1024, (_vmem_capacity_bytes() * 3) // 4)


@functools.lru_cache(maxsize=None)
def _block_budget_bytes():
    # Per-grid-step budget for blocks (double/triple-buffered I/O + f32 temps).
    return _vmem_limit_bytes() // 2


@functools.lru_cache(maxsize=None)
def _num_tc_per_chip():
    kind = _device_kind()
    return 2 if any(t in kind for t in ("v7", "v4", "v5p")) else 1


@functools.lru_cache(maxsize=None)
def _deep_buffer():
    # Extra input-buffer depth only pays on v7x (fast HBM -> per-step overhead
    # is a larger fraction of the loop).
    return "v7" in _device_kind()


def _x_block_spec(block_shape, index_map):
    """x-input BlockSpec, with 3-deep pipelining on v7x when available."""
    if _deep_buffer():
        try:
            return pl.BlockSpec(block_shape, index_map,
                                pipeline_mode=pl.Buffered(3))
        except Exception:
            pass
    return pl.BlockSpec(block_shape, index_map)


def _choose_tile_rows(n_rows, c, dtype, *, n_f32_tmp, in_buffers=2, out_buffers=2):
    """Largest row tile fitting the per-step VMEM budget (multiple of 16)."""
    itemsize = jnp.dtype(dtype).itemsize
    bytes_per_row = (in_buffers + out_buffers) * c * itemsize + n_f32_tmp * c * 4
    t = _block_budget_bytes() // max(bytes_per_row, 1)
    if t >= n_rows:
        return int(n_rows)                       # single full-extent block
    t = max(16, (t // 16) * 16)
    return int(min(t, n_rows))


def _lane_fold_factor(n_rows, c):
    """Smallest g>1 with (g*c) % 128 == 0 and n_rows % g == 0, else 1."""
    if c % 128 == 0:
        return 1
    g = 128 // math.gcd(c, 128)
    if g > 1 and n_rows % g == 0:
        return g
    return 1


# ---------------------------------------------------------------------------
# Kernel 1: per-channel partial sums for BatchNorm1d (training mode).
# Output (nsplit, 2, C): [sum(x); sum(x*x)] per split; combined in the wrapper.
# Leading grid axis is "parallel" (split across TCs on multi-core chips).
# ---------------------------------------------------------------------------
def bn_stats_kernel(x_ref, part_ref, *, tile_rows, tiles_per_split, n_valid,
                    needs_mask):
    p = pl.program_id(0)
    i = pl.program_id(1)

    @pl.when(i == 0)
    def _():
        part_ref[...] = jnp.zeros_like(part_ref)

    x = x_ref[...].astype(jnp.float32)

    if needs_mask:
        # Only the ragged tail / clamped phantom block pays for the mask.
        row0 = (p * tiles_per_split + i) * tile_rows
        is_tail = row0 + tile_rows > n_valid

        @pl.when(is_tail)
        def _():
            rows = jax.lax.broadcasted_iota(jnp.int32, (tile_rows, 1), 0) + row0
            xm = jnp.where(rows < n_valid, x, 0.0)
            part_ref[0:1, :] += jnp.sum(xm, axis=0, keepdims=True)
            part_ref[1:2, :] += jnp.sum(xm * xm, axis=0, keepdims=True)

        @pl.when(jnp.logical_not(is_tail))
        def _():
            part_ref[0:1, :] += jnp.sum(x, axis=0, keepdims=True)
            part_ref[1:2, :] += jnp.sum(x * x, axis=0, keepdims=True)
    else:
        part_ref[0:1, :] += jnp.sum(x, axis=0, keepdims=True)
        part_ref[1:2, :] += jnp.sum(x * x, axis=0, keepdims=True)


def bn_partial_sums(x2d, *, tile_rows, nsplit=None):
    n, c = x2d.shape
    num_tiles = pl.cdiv(n, tile_rows)
    if nsplit is None:
        nsplit = _num_tc_per_chip()
    nsplit = max(1, min(int(nsplit), num_tiles))
    tiles_per_split = pl.cdiv(num_tiles, nsplit)
    needs_mask = (n % tile_rows != 0) or (nsplit * tiles_per_split != num_tiles)

    def x_map(p, i):
        blk = p * tiles_per_split + i
        # Clamp phantom blocks (nsplit*tiles_per_split > num_tiles) back in
        # bounds; their rows are fully masked off inside the kernel.
        return (jnp.minimum(blk, num_tiles - 1), 0)

    kernel = functools.partial(
        bn_stats_kernel, tile_rows=tile_rows, tiles_per_split=tiles_per_split,
        n_valid=n, needs_mask=needs_mask)

    return pl.pallas_call(
        kernel,
        out_shape=jax.ShapeDtypeStruct((nsplit, 2, c), jnp.float32),
        grid=(nsplit, tiles_per_split),
        in_specs=[_x_block_spec((tile_rows, c), x_map)],
        out_specs=pl.BlockSpec((None, 2, c), lambda p, i: (p, 0, 0)),
        compiler_params=pltpu.CompilerParams(
            dimension_semantics=("parallel", "arbitrary"),
            vmem_limit_bytes=_vmem_limit_bytes()),
    )(x2d)


# ---------------------------------------------------------------------------
# Kernel 2: fused normalization over row tiles, specialized at trace time.
# BN, alpha and the lamda blend weights are pre-folded into per-channel affines
# in the wrapper, so the per-element work is minimal:
#   mode == "ln"   :  out = xhat * ln_scale + shift
#   mode == "rep"  :  out = x    * rep_scale + shift
#   mode == "blend":  out = xhat * ln_scale + x * rep_scale + shift
# where xhat = (x - mu_row) * rsqrt(var_row + eps).
# Params packed in one (4, C) f32 block: [ln_scale; rep_scale; shift; 0].
# ---------------------------------------------------------------------------
def norm_kernel(x_ref, prm_ref, o_ref, *, mode):
    x = x_ref[...].astype(jnp.float32)                       # (TR, C)
    prm = prm_ref[...]                                       # (4, C) f32
    ln_scale = prm[0:1, :]
    rep_scale = prm[1:2, :]
    shift = prm[2:3, :]

    if mode == "rep":
        out = x * rep_scale + shift
    else:
        inv_c = 1.0 / x.shape[-1]
        mu = jnp.sum(x, axis=-1, keepdims=True) * inv_c
        msq = jnp.sum(x * x, axis=-1, keepdims=True) * inv_c
        var = jnp.maximum(msq - mu * mu, 0.0)                # E[x^2] - mu^2
        xhat = (x - mu) * jax.lax.rsqrt(var + LN_EPS)
        if mode == "ln":
            out = xhat * ln_scale + shift
        else:  # blend
            out = xhat * ln_scale + x * rep_scale + shift
    # Ragged last tile: OOB rows produce garbage here but their stores are
    # dropped by Pallas, so results are unaffected.
    o_ref[...] = out.astype(o_ref.dtype)


def norm_call(x2d, prm, *, mode, tile_rows):
    n, c = x2d.shape
    return pl.pallas_call(
        functools.partial(norm_kernel, mode=mode),
        out_shape=jax.ShapeDtypeStruct((n, c), x2d.dtype),
        grid=(pl.cdiv(n, tile_rows),),
        in_specs=[
            _x_block_spec((tile_rows, c), lambda i: (i, 0)),   # x (native dtype)
            pl.BlockSpec((4, c), lambda i: (0, 0)),            # packed params f32
        ],
        out_specs=pl.BlockSpec((tile_rows, c), lambda i: (i, 0)),
        compiler_params=pltpu.CompilerParams(
            dimension_semantics=("parallel",),
            vmem_limit_bytes=_vmem_limit_bytes()),
    )(x2d, prm)


# ---------------------------------------------------------------------------
# Wrapper reproducing LinearNorm.forward branching.
# `training` / `warm` must be Python values (they pick the kernel variant, as
# in the torch module); `it` / `total_step` / `r0` may be traced values --
# lamda is folded into the per-channel affine params, so changing `it` every
# step does not recompile anything.
# ---------------------------------------------------------------------------
def linear_norm_forward(x, params, *, training, warm, it, total_step, r0,
                        tile_rows=None, stats_tile_rows=None, nsplit=None,
                        bn_momentum=0.1, return_updated_bn_stats=False):
    b, t, c = x.shape
    n = b * t
    x2d = x.reshape(n, c)                       # native dtype, no upcast pass
    f32 = jnp.float32

    ln_g = jnp.asarray(params["ln_gamma"], f32).reshape(1, c)
    ln_b = jnp.asarray(params["ln_beta"], f32).reshape(1, c)
    bn_g = jnp.asarray(params["bn_gamma"], f32).reshape(1, c)
    bn_b = jnp.asarray(params["bn_beta"], f32).reshape(1, c)
    alpha = jnp.asarray(params["alpha"], f32).reshape(-1)[0]
    zeros = jnp.zeros((1, c), f32)

    updated_bn_stats = None

    if training and warm > 0:
        mode = "ln"                             # skip BN stats pass entirely
        ln_scale, rep_scale, shift = ln_g, zeros, ln_b
    else:
        if training:
            mode = "blend"
            # --- BN batch statistics over all (batch, seq) rows -------------
            # Lane-fold the streaming-read stats pass when C is not lane-dense.
            g = _lane_fold_factor(n, c)
            xs = x2d.reshape(n // g, g * c) if g > 1 else x2d
            str_ = stats_tile_rows
            if str_ is None:
                str_ = _choose_tile_rows(
                    xs.shape[0], xs.shape[1], xs.dtype, n_f32_tmp=2,
                    in_buffers=3 if _deep_buffer() else 2, out_buffers=0)
            partials = bn_partial_sums(xs, tile_rows=str_, nsplit=nsplit)
            tot = jnp.sum(partials, axis=0)                  # (2, g*C) combine
            if g > 1:
                tot = tot.reshape(2, g, c).sum(axis=1)       # fold lane groups
            mean = tot[0] * (1.0 / n)
            var = jnp.maximum(tot[1] * (1.0 / n) - mean * mean, 0.0)  # biased
            # lamda is runtime math on params (no kernel recompile per step).
            lamda = (jnp.asarray(r0, f32) * jnp.asarray(it, f32)
                     / jnp.asarray(total_step, f32))
            if return_updated_bn_stats:
                unbiased = var * (float(n) / float(max(n - 1, 1)))
                rm = jnp.asarray(params["bn_running_mean"], f32)
                rv = jnp.asarray(params["bn_running_var"], f32)
                updated_bn_stats = (
                    (1.0 - bn_momentum) * rm + bn_momentum * mean,
                    (1.0 - bn_momentum) * rv + bn_momentum * unbiased)
        else:
            mode = "rep"                        # skip the LayerNorm math
            lamda = jnp.asarray(0.0, f32)
            mean = jnp.asarray(params["bn_running_mean"], f32)
            var = jnp.asarray(params["bn_running_var"], f32)

        mean = mean.reshape(1, c)
        var = var.reshape(1, c)
        # Fold BN + alpha into a single per-channel affine:
        #   BN(x) + alpha*x = x * (bn_scale + alpha) + bn_shift
        bn_scale = bn_g * jax.lax.rsqrt(var + BN_EPS)
        bn_shift = bn_b - mean * bn_scale
        if mode == "rep":
            ln_scale = zeros
            rep_scale = bn_scale + alpha
            shift = bn_shift
        else:  # blend: fold lamda / (1-lamda) into the affines too
            ln_scale = lamda * ln_g
            rep_scale = (1.0 - lamda) * (bn_scale + alpha)
            shift = lamda * ln_b + (1.0 - lamda) * bn_shift

    prm = jnp.concatenate([ln_scale, rep_scale, shift, zeros], axis=0)  # (4, C)

    n_tmp = {"ln": 4, "rep": 3, "blend": 5}[mode]     # mode-aware temp estimate
    if tile_rows is None:
        tile_rows = _choose_tile_rows(
            n, c, x2d.dtype, n_f32_tmp=n_tmp,
            in_buffers=3 if _deep_buffer() else 2, out_buffers=2)

    out2d = norm_call(x2d, prm, mode=mode, tile_rows=tile_rows)
    out = out2d.reshape(b, t, c)
    if return_updated_bn_stats:
        return out, updated_bn_stats
    return out


# ---------------------------------------------------------------------------
# Pure-JAX reference (f32 math).
# ---------------------------------------------------------------------------
def ref_forward(x, params, *, training, warm, it, total_step, r0):
    x = x.astype(jnp.float32)
    ln_g = params["ln_gamma"]
    ln_b = params["ln_beta"]
    bn_g = params["bn_gamma"]
    bn_b = params["bn_beta"]
    alpha = params["alpha"]

    mu = jnp.mean(x, axis=-1, keepdims=True)
    var = jnp.mean((x - mu) ** 2, axis=-1, keepdims=True)
    ln = (x - mu) / jnp.sqrt(var + LN_EPS) * ln_g + ln_b
    if training and warm > 0:
        return ln

    if training:
        bm = jnp.mean(x, axis=(0, 1))
        bv = jnp.mean((x - bm) ** 2, axis=(0, 1))
    else:
        bm = params["bn_running_mean"]
        bv = params["bn_running_var"]
    bn = (x - bm) / jnp.sqrt(bv + BN_EPS) * bn_g + bn_b
    rep = bn + alpha * x
    if not training:
        return rep
    lamda = r0 * it / total_step
    return lamda * ln + (1.0 - lamda) * rep


if __name__ == "__main__":
    key = jax.random.PRNGKey(0)
    kx, kg1, kb1, kg2, kb2, krm, krv, kx2, kx3 = jax.random.split(key, 9)

    def make_params(c):
        return {
            "ln_gamma": (1.0 + 0.1 * jax.random.normal(kg1, (c,))).astype(jnp.float32),
            "ln_beta":  (0.1 * jax.random.normal(kb1, (c,))).astype(jnp.float32),
            "bn_gamma": (1.0 + 0.1 * jax.random.normal(kg2, (c,))).astype(jnp.float32),
            "bn_beta":  (0.1 * jax.random.normal(kb2, (c,))).astype(jnp.float32),
            "bn_running_mean": (0.1 * jax.random.normal(krm, (c,))).astype(jnp.float32),
            "bn_running_var":  (1.0 + 0.1 * jax.random.uniform(krv, (c,))).astype(jnp.float32),
            "alpha": 1.0,
        }

    def check(out, ref, atol, rtol, tag):
        err = float(jnp.max(jnp.abs(out.astype(jnp.float32) - ref)))
        assert jnp.allclose(out.astype(jnp.float32), ref, rtol=rtol, atol=atol), (tag, err)

    # --- case 1: training blend path (warm=0, lamda=0.5), f32 -----------------
    B, T, C = 2, 8, 32
    params = make_params(C)
    x = jax.random.normal(kx, (B, T, C), dtype=jnp.float32)
    cfg = dict(training=True, warm=0, it=5000, total_step=10000, r0=1.0)
    out = linear_norm_forward(x, params, **cfg)
    jax.block_until_ready(out)
    check(out, ref_forward(x, params, **cfg), 1e-4, 1e-4, "train_blend_f32")

    # --- case 2: eval path (running stats, RepBN-affine-only kernel) ----------
    cfg_e = dict(training=False, warm=0, it=10000, total_step=10000, r0=1.0)
    out = linear_norm_forward(x, params, **cfg_e)
    jax.block_until_ready(out)
    check(out, ref_forward(x, params, **cfg_e), 1e-4, 1e-4, "eval_rep_f32")

    # --- case 3: warm-up path (LN-only kernel, stats pass skipped) -------------
    cfg_w = dict(training=True, warm=3, it=10000, total_step=10000, r0=1.0)
    out = linear_norm_forward(x, params, **cfg_w)
    jax.block_until_ready(out)
    check(out, ref_forward(x, params, **cfg_w), 1e-4, 1e-4, "warm_ln_f32")

    # --- case 4: ragged rows + forced small tiles + forced 2-way stats split
    #             (exercises tail-only masking and the clamped phantom block) ---
    B2, T2 = 5, 9                                   # N = 45, 3 stats tiles of 16
    x2 = jax.random.normal(kx2, (B2, T2, C), dtype=jnp.float32)
    out = linear_norm_forward(x2, params, **cfg, tile_rows=16,
                              stats_tile_rows=16, nsplit=2)
    jax.block_until_ready(out)
    check(out, ref_forward(x2, params, **cfg), 1e-4, 1e-4, "train_blend_ragged")

    # --- case 5: native bf16 I/O smoke test (math stays f32 inside kernel) ----
    xb = x.astype(jnp.bfloat16)
    out = linear_norm_forward(xb, params, **cfg)
    jax.block_until_ready(out)
    check(out, ref_forward(xb, params, **cfg), 5e-2, 5e-2, "train_blend_bf16")

    # --- case 6: lane-dense C (multiple of 128), auto tile sizing, plus the
    #             optional BatchNorm running-stat update ------------------------
    B3, T3, C3 = 4, 512, 256
    params3 = make_params(C3)
    x3 = jax.random.normal(kx3, (B3, T3, C3), dtype=jnp.float32)
    out, (nrm, nrv) = linear_norm_forward(x3, params3, **cfg,
                                          return_updated_bn_stats=True)
    jax.block_until_ready((out, nrm, nrv))
    check(out, ref_forward(x3, params3, **cfg), 5e-4, 5e-4, "train_blend_c256")

    print("KERNEL_OK")
</pallas_src>

<mosaic_0001>
module attributes {stable_mosaic.version = 11 : i64} {
  func.func @bn_stats_kernel(%arg0: i32, %arg1: i32, %arg2: memref<4x128xf32, #tpu.memory_space<vmem>>, %arg3: memref<1x2x128xf32, #tpu.memory_space<vmem>>) attributes {dimension_semantics = [#tpu.dimension_semantics<parallel>, #tpu.dimension_semantics<arbitrary>], iteration_bounds = array<i64: 1, 1>, scalar_prefetch = 0 : i64, scratch_operands = 0 : i64, tpu.core_type = #tpu.core_type<tc>, window_params = [{transform_indices = @transform_0, window_bounds = array<i64: 4, 128>}, {transform_indices = @transform_1, window_bounds = array<i64: 1, 2, 128>}]} {
    %c0_i32 = arith.constant 0 : i32
    %0 = arith.cmpi eq, %arg1, %c0_i32 : i32
    %1 = arith.extui %0 : i1 to i32
    %c0_i32_0 = arith.constant 0 : i32
    %2 = arith.cmpi ne, %1, %c0_i32_0 : i32
    scf.if %2 {
      %cst_14 = arith.constant 0.000000e+00 : f32
      %21 = vector.broadcast %cst_14 : f32 to vector<2x128xf32>
      %c0_15 = arith.constant 0 : index
      %c0_16 = arith.constant 0 : index
      %c0_17 = arith.constant 0 : index
      %22 = vector.load %arg3[%c0_15, %c0_16, %c0_17] : memref<1x2x128xf32, #tpu.memory_space<vmem>>, vector<1x2x128xf32>
      %23 = vector.shape_cast %22 : vector<1x2x128xf32> to vector<2x128xf32>
      %24 = vector.shape_cast %21 : vector<2x128xf32> to vector<1x2x128xf32>
      tpu.vector_store %arg3[%c0_15, %c0_16, %c0_17], %24 {strides = array<i32>} : memref<1x2x128xf32, #tpu.memory_space<vmem>>, vector<1x2x128xf32>,
    } else {
    }
    %c0 = arith.constant 0 : index
    %c0_1 = arith.constant 0 : index
    %3 = vector.load %arg2[%c0, %c0_1] : memref<4x128xf32, #tpu.memory_space<vmem>>, vector<4x128xf32>
    %c0_2 = arith.constant 0 : index
    %c0_3 = arith.constant 0 : index
    %c0_4 = arith.constant 0 : index
    %4 = vector.load %arg3[%c0_2, %c0_3, %c0_4] : memref<1x2x128xf32, #tpu.memory_space<vmem>>, vector<1x1x128xf32>
    %5 = vector.shape_cast %4 : vector<1x1x128xf32> to vector<1x128xf32>
    %cst = arith.constant dense<0.000000e+00> : vector<128xf32>
    %6 = vector.multi_reduction <add>, %3, %cst [0] : vector<4x128xf32> to vector<128xf32>
    %7 = vector.shape_cast %6 : vector<128xf32> to vector<1x128xf32>
    %8 = arith.addf %5, %7 : vector<1x128xf32>
    %c0_5 = arith.constant 0 : index
    %c0_6 = arith.constant 0 : index
    %c0_7 = arith.constant 0 : index
    %9 = vector.load %arg3[%c0_5, %c0_6, %c0_7] : memref<1x2x128xf32, #tpu.memory_space<vmem>>, vector<1x1x128xf32>
    %10 = vector.shape_cast %9 : vector<1x1x128xf32> to vector<1x128xf32>
    %11 = vector.shape_cast %8 : vector<1x128xf32> to vector<1x1x128xf32>
    tpu.vector_store %arg3[%c0_5, %c0_6, %c0_7], %11 {strides = array<i32>} : memref<1x2x128xf32, #tpu.memory_space<vmem>>, vector<1x1x128xf32>,
    %c0_8 = arith.constant 0 : index
    %c1 = arith.constant 1 : index
    %c0_9 = arith.constant 0 : index
    %12 = vector.load %arg3[%c0_8, %c1, %c0_9] : memref<1x2x128xf32, #tpu.memory_space<vmem>>, vector<1x1x128xf32>
    %13 = vector.shape_cast %12 : vector<1x1x128xf32> to vector<1x128xf32>
    %14 = arith.mulf %3, %3 : vector<4x128xf32>
    %cst_10 = arith.constant dense<0.000000e+00> : vector<128xf32>
    %15 = vector.multi_reduction <add>, %14, %cst_10 [0] : vector<4x128xf32> to vector<128xf32>
    %16 = vector.shape_cast %15 : vector<128xf32> to vector<1x128xf32>
    %17 = arith.addf %13, %16 : vector<1x128xf32>
    %c0_11 = arith.constant 0 : index
    %c1_12 = arith.constant 1 : index
    %c0_13 = arith.constant 0 : index
    %18 = vector.load %arg3[%c0_11, %c1_12, %c0_13] : memref<1x2x128xf32, #tpu.memory_space<vmem>>, vector<1x1x128xf32>
    %19 = vector.shape_cast %18 : vector<1x1x128xf32> to vector<1x128xf32>
    %20 = vector.shape_cast %17 : vector<1x128xf32> to vector<1x1x128xf32>
    tpu.vector_store %arg3[%c0_11, %c1_12, %c0_13], %20 {strides = array<i32>} : memref<1x2x128xf32, #tpu.memory_space<vmem>>, vector<1x1x128xf32>,
    return
  }
  func.func @transform_0(%arg0: i32, %arg1: i32) -> (i32, i32) {
    %c1_i32 = arith.constant 1 : i32
    %0 = arith.muli %arg0, %c1_i32 : i32
    %1 = arith.addi %0, %arg1 : i32
    %c0_i32 = arith.constant 0 : i32
    %2 = arith.minsi %1, %c0_i32 : i32
    %c0_i32_0 = arith.constant 0 : i32
    %c0_i32_1 = arith.constant 0 : i32
    return %2, %c0_i32_0 : i32, i32
  }
  func.func @transform_1(%arg0: i32, %arg1: i32) -> (i32, i32, i32) {
    %c0_i32 = arith.constant 0 : i32
    %c0_i32_0 = arith.constant 0 : i32
    %c0_i32_1 = arith.constant 0 : i32
    return %arg0, %c0_i32, %c0_i32_0 : i32, i32, i32
  }
}

</mosaic_0001>

<bundles_post_ra>
// kernel: tpu_custom_call.1
= control target key start
LH: loop header
LB: loop body
LE: loop exit
PB: predicated region body
PF: predicated region fallthrough
CT: control target
= control target key end

     0   :  { %6 = vsyncpa [#allocation3], 0  ;;  %s162_s0 = inlined_call_operand.hbm [shape: f32[4,128], index: 0, kind: input, shape index: {}]   ;;  %s163_s1 = inlined_call_operand.hbm [shape: f32[1,2,128], index: 1, kind: output, shape index: {}]  }
   0x1   :  { %7 = vsyncpa [#allocation4], 0  ;;  %s125_s6 = smov [#allocation2]   ;;  %s77_s10 = scalar_lea.hbm %s162_s0, 64 }
   0x2   :  { %s19_s7 = sshll.u32 %s125_s6, 4  ;;  %p78_p0 = scmp.ne.s32.totalorder %s162_s0, %s77_s10  ;;  %s20_s7 = int_to_ptr.vmem [resolvable:$true] %s19_s7 }
   0x3   :  { %p81_p1 = scmp.lt.u32.totalorder %s77_s10, %s162_s0 }
   0x5   :  { %p83_p2 = pnand %p81_p1, %p78_p0 }
   0x7   :  { %86 = shalt.err (!%p83_p2)
}
   0x8   :  { %s87_s15 = scalar_lea.vmem %s20_s7, 64  ;;  %p92_p4 = scmp.lt.s32.totalorder %s20_s7, %s20_s7 }
   0x9   :  { %p88_p3 = scmp.ne.s32.totalorder %s20_s7, %s87_s15  ;;  %p93_p5 = scmp.lt.s32.totalorder %s87_s15, %s87_s15 }
   0xb   :  { %p94_p6 = por %p93_p5, %p92_p4 }
   0xd   :  { %p95_p7 = pnand %p94_p6, %p88_p3 }
   0xf   :  { %98 = shalt.err (!%p95_p7)
}
  0x10   :  { %22 = dma.hbm_to_vmem [thread:$0]  %s162_s0, 64, %s20_s7, [#allocation3]  }
  0x11   :  { %121 = dma.done.wait [#allocation3], 64  }
  0x12   :  { %122 = vsyncadd [#allocation3], 4294967232  ;;  %v126_v0 = vmov 0.0   ;;  %vm36_vm0 = vcmask 1043456   ;;  %v34_v1 = vld [vmem:[#allocation2] sm:$0xf] }
  0x13   :  { %33 = vst [vmem:[#allocation5] sm:$0x3] %v126_v0  ;;  %v37_v2 = vsel %vm36_vm0, %v34_v1, 0.0  ;;  %v47_v3 = vmul.f32 %v34_v1, %v34_v1  ;;  %s127_s0 = smov [#allocation5]  }
  0x14   :  { %v38_v4 = vrot.slane %v37_v2, 4  ;;  %s63_s18 = sshll.u32 %s127_s0, 4  ;;  %s64_s18 = int_to_ptr.vmem [resolvable:$true] %s63_s18 }
  0x15   :  { %v48_v5 = vsel %vm36_vm0, %v47_v3, 0.0  ;;  %s99_s19 = scalar_lea.vmem %s64_s18, 32  ;;  %p104_p9 = scmp.lt.s32.totalorder %s64_s18, %s64_s18 }
  0x16   :  { %v39_v6 = vadd.f32 %v38_v4, %v37_v2  ;;  %v49_v7 = vrot.slane %v48_v5, 4  ;;  %p100_p8 = scmp.ne.s32.totalorder %s64_s18, %s99_s19  ;;  %p105_p10 = scmp.lt.s32.totalorder %s99_s19, %s99_s19 }
  0x18   :  { %v40_v8 = vrot.slane %v39_v6, 2  ;;  %v50_v9 = vadd.f32 %v49_v7, %v48_v5  ;;  %p106_p11 = por %p105_p10, %p104_p9 }
  0x1a   :  { %v41_v10 = vadd.f32 %v40_v8, %v39_v6  ;;  %v51_v11 = vrot.slane %v50_v9, 2  ;;  %v35_v14 = vld [vmem:[#allocation5] sm:$0x1]  ;;  %v46_v17 = vld [vmem:[#allocation5 + $0x1] sm:$0x1]  ;;  %p107_p12 = pnand %p106_p11, %p100_p8 }
  0x1c   :  { %v42_v12 = vrot.slane %v41_v10, 1  ;;  %v52_v13 = vadd.f32 %v51_v11, %v50_v9 }
  0x1e   :  { %v43_v15 = vadd.f32 %v42_v12, %v41_v10  ;;  %v53_v16 = vrot.slane %v52_v13, 1 }
  0x20   :  { %v44_v18 = vadd.f32 %v43_v15, %v35_v14  ;;  %v54_v19 = vadd.f32 %v53_v16, %v52_v13 }
  0x22   :  { %45 = vst [vmem:[#allocation5] sm:$0x1] %v44_v18  ;;  %v55_v20 = vadd.f32 %v54_v19, %v46_v17 }
  0x24   :  { %56 = vst [vmem:[#allocation5 + $0x1] sm:$0x1] %v55_v20 }
  0x25   :  { %110 = shalt.err (!%p107_p12)
}
  0x26   :  { %s111_s22 = scalar_lea.hbm %s163_s1, 32 }
  0x27   :  { %p112_p13 = scmp.ne.s32.totalorder %s163_s1, %s111_s22  ;;  %p115_p0 = scmp.lt.u32.totalorder %s111_s22, %s163_s1 }
  0x29   :  { %p117_p1 = pnand %p115_p0, %p112_p13 }
  0x2b   :  { %120 = shalt.err (!%p117_p1)
}
  0x2c   :  { %66 = dma.vmem_to_hbm [thread:$0]  %s64_s18, 32, %s163_s1, [#allocation4]  }
  0x2d   :  { %123 = dma.done.wait [#allocation4], 32  }
  0x2e   :  { %124 = vsyncadd [#allocation4], 4294967264 }
  0x2f   :  { %70 = vsyncpa [#allocation3], 1 }
  0x30   :  { %71 = vsyncpa [#allocation4], 1 }

</bundles_post_ra>
